<compile_context>
chip_gen: v5e
topology: v5e:2x2
jax: 0.10.0
libtpu: 0.0.40
codegen_flags: <defaults>
</compile_context>

<pallas_src>
import functools

import jax
import jax.numpy as jnp
from jax.experimental import pallas as pl
from jax.experimental.pallas import tpu as pltpu


# --------------------------------------------------------------------------
# Pallas kernel: one batch image per grid step.
# --------------------------------------------------------------------------
def _se_kernel(x_ref, w1_ref, b1_ref, w2_ref, b2_ref, o_ref, *, inv_hw):
    # x_ref, o_ref : (1, H, W*C)   lane-dense view of the NHWC image
    # w1_ref       : (W*C, Cr)     linear1 weight, pre-expanded over W
    # b1_ref       : (1, Cr)
    # w2_ref       : (Cr, W*C)     linear2 weight, pre-tiled over W
    # b2_ref       : (1, W*C)      linear2 bias,   pre-tiled over W
    x2d = x_ref[0]                                         # (H, W*C)

    # Squeeze: global average pool.  Sum over H is a single sublane reduce;
    # the per-channel sum over W is folded into the first MXU matmul because
    # w1e rows repeat the (C, Cr) weight W times (w-major, c-minor lanes).
    col = jnp.sum(x2d, axis=0, keepdims=True)              # (1, W*C)
    h = jnp.dot(col, w1_ref[...], preferred_element_type=jnp.float32)
    h = h * inv_hw + b1_ref[...]                           # (1, Cr)
    h = jnp.maximum(h, 0.0)                                # ReLU

    # Excitation: second matmul emits the sigmoid gate already tiled over W
    # in (W*C) lanes, so the rescale below is a plain broadcast-over-sublanes
    # multiply with no in-kernel tile/reshape.
    z = jnp.dot(h, w2_ref[...], preferred_element_type=jnp.float32) + b2_ref[...]
    s = 1.0 / (1.0 + jnp.exp(-z))                          # (1, W*C), EUP exp

    o_ref[...] = (x2d * s).reshape(o_ref.shape).astype(o_ref.dtype)


def se_module_pallas(x_nhwc, w1_sn, b1, w2_sn, b2):
    """Squeeze-Excitation forward.

    x_nhwc : (N, H, W, C)
    w1_sn  : (Cr, C)  spectrally-normalized linear1 weight (torch (out, in))
    b1     : (Cr,)
    w2_sn  : (C, Cr)  spectrally-normalized linear2 weight (torch (out, in))
    b2     : (C,)
    returns (N, H, W, C) = x * sigmoid(W2 relu(W1 avgpool(x) + b1) + b2)
    """
    N, H, W, C = x_nhwc.shape
    Cr = w1_sn.shape[0]
    WC = W * C

    # Lane-dense view: NHWC is contiguous, so this is a free reshape.
    x2 = x_nhwc.reshape(N, H, WC)

    # Glue: expand the tiny linear weights so the kernel's matmuls consume /
    # produce data directly in the (W*C)-lane layout (w-major, c-minor).
    w1e = jnp.tile(w1_sn.T, (W, 1))                        # (W*C, Cr)
    b1e = b1.reshape(1, Cr)
    w2e = jnp.tile(w2_sn.T, (1, W))                        # (Cr, W*C)
    b2e = jnp.tile(b2.reshape(1, C), (1, W))               # (1, W*C)

    kernel = functools.partial(_se_kernel, inv_hw=1.0 / float(H * W))

    out = pl.pallas_call(
        kernel,
        out_shape=jax.ShapeDtypeStruct((N, H, WC), x_nhwc.dtype),
        grid_spec=pltpu.PrefetchScalarGridSpec(
            num_scalar_prefetch=0,
            grid=(N,),
            in_specs=[
                pl.BlockSpec((1, H, WC), lambda b: (b, 0, 0)),
                pl.BlockSpec((WC, Cr), lambda b: (0, 0)),
                pl.BlockSpec((1, Cr), lambda b: (0, 0)),
                pl.BlockSpec((Cr, WC), lambda b: (0, 0)),
                pl.BlockSpec((1, WC), lambda b: (0, 0)),
            ],
            out_specs=pl.BlockSpec((1, H, WC), lambda b: (b, 0, 0)),
        ),
        compiler_params=pltpu.CompilerParams(
            dimension_semantics=("parallel",)),
    )(x2, w1e, b1e, w2e, b2e)

    return out.reshape(N, H, W, C)


# --------------------------------------------------------------------------
# Glue: spectral normalization (nn.utils.spectral_norm semantics: one power
# iteration with a deterministic u init, weight / sigma).  Parameter
# preprocessing, not part of the kernel.
# --------------------------------------------------------------------------
def spectral_normalize(w, key, n_power_iterations=1, eps=1e-12):
    O = w.shape[0]
    w_mat = w.reshape(O, -1)
    u = jax.random.normal(key, (O,), jnp.float32)
    u = u / (jnp.linalg.norm(u) + eps)
    v = w_mat.T @ u
    v = v / (jnp.linalg.norm(v) + eps)
    for _ in range(n_power_iterations):
        v = w_mat.T @ u
        v = v / (jnp.linalg.norm(v) + eps)
        u = w_mat @ v
        u = u / (jnp.linalg.norm(u) + eps)
    sigma = u @ (w_mat @ v)
    return w / sigma


# --------------------------------------------------------------------------
# Pure-JAX reference (matches the PyTorch forward) for correctness checking.
# --------------------------------------------------------------------------
def _ref_se(x_nhwc, w1_sn, b1, w2_sn, b2):
    pooled = jnp.mean(x_nhwc, axis=(1, 2))                 # avg_pool2d over HxW
    h = jnp.maximum(pooled @ w1_sn.T + b1, 0.0)            # linear1 + ReLU
    s = jax.nn.sigmoid(h @ w2_sn.T + b2)                   # linear2 + Sigmoid
    return x_nhwc * s[:, None, None, :]                    # x * y


# --------------------------------------------------------------------------
if __name__ == "__main__":
    key = jax.random.PRNGKey(0)
    k1, k2, k3, k4, k5, k6, k7 = jax.random.split(key, 7)

    # SEModule requires n_features % reduction == 0 (reduction = 16).
    N, C, H, W = 2, 32, 16, 16
    reduction = 16
    if C % reduction == 3:
        reduction = 1
    assert C % reduction == 0
    Cr = C // reduction                                     # 2

    # PyTorch-style NCHW input, converted to NHWC for the kernel.
    x_nchw = jax.random.normal(k1, (N, C, H, W), jnp.float32)
    x = jnp.transpose(x_nchw, (0, 2, 3, 1))                 # (N, H, W, C)

    # Deterministic nn.Linear-style init (kaiming-uniform bound), then
    # spectral normalization (glue).
    bnd1 = 1.0 / (C ** 0.5)
    w1 = jax.random.uniform(k2, (Cr, C), jnp.float32, -bnd1, bnd1)
    b1 = jax.random.uniform(k3, (Cr,), jnp.float32, -bnd1, bnd1)
    bnd2 = 1.0 / (Cr ** 0.5)
    w2 = jax.random.uniform(k4, (C, Cr), jnp.float32, -bnd2, bnd2)
    b2 = jax.random.uniform(k5, (C,), jnp.float32, -bnd2, bnd2)
    w1_sn = spectral_normalize(w1, k6)
    w2_sn = spectral_normalize(w2, k7)

    out = se_module_pallas(x, w1_sn, b1, w2_sn, b2)
    out = jax.block_until_ready(out)

    ref = _ref_se(x, w1_sn, b1, w2_sn, b2)
    assert jnp.allclose(out, ref, atol=1e-4, rtol=1e-4), \
        float(jnp.max(jnp.abs(out - ref)))

    print("KERNEL_OK")
</pallas_src>

<mosaic_0001>
module attributes {stable_mosaic.version = 11 : i64} {
  func.func @_se_kernel(%arg0: i32, %arg1: memref<1x16x512xf32, #tpu.memory_space<vmem>>, %arg2: memref<512x2xf32, #tpu.memory_space<vmem>>, %arg3: memref<1x2xf32, #tpu.memory_space<vmem>>, %arg4: memref<2x512xf32, #tpu.memory_space<vmem>>, %arg5: memref<1x512xf32, #tpu.memory_space<vmem>>, %arg6: memref<1x16x512xf32, #tpu.memory_space<vmem>>) attributes {dimension_semantics = [#tpu.dimension_semantics<parallel>], iteration_bounds = array<i64: 2>, scalar_prefetch = 0 : i64, scratch_operands = 0 : i64, tpu.core_type = #tpu.core_type<tc>, window_params = [{transform_indices = @transform_0, window_bounds = array<i64: 1, 16, 512>}, {pipeline_mode = #tpu.pipeline_mode<synchronous>, transform_indices = @transform_1, window_bounds = array<i64: 512, 2>}, {pipeline_mode = #tpu.pipeline_mode<synchronous>, transform_indices = @transform_2, window_bounds = array<i64: 1, 2>}, {pipeline_mode = #tpu.pipeline_mode<synchronous>, transform_indices = @transform_3, window_bounds = array<i64: 2, 512>}, {pipeline_mode = #tpu.pipeline_mode<synchronous>, transform_indices = @transform_4, window_bounds = array<i64: 1, 512>}, {transform_indices = @transform_5, window_bounds = array<i64: 1, 16, 512>}]} {
    %c0 = arith.constant 0 : index
    %c0_0 = arith.constant 0 : index
    %c0_1 = arith.constant 0 : index
    %0 = vector.load %arg1[%c0, %c0_0, %c0_1] : memref<1x16x512xf32, #tpu.memory_space<vmem>>, vector<1x16x512xf32>
    %1 = vector.shape_cast %0 : vector<1x16x512xf32> to vector<16x512xf32>
    %cst = arith.constant dense<0.000000e+00> : vector<512xf32>
    %2 = vector.multi_reduction <add>, %1, %cst [0] : vector<16x512xf32> to vector<512xf32>
    %3 = vector.shape_cast %2 : vector<512xf32> to vector<1x512xf32>
    %c0_2 = arith.constant 0 : index
    %c0_3 = arith.constant 0 : index
    %4 = vector.load %arg2[%c0_2, %c0_3] : memref<512x2xf32, #tpu.memory_space<vmem>>, vector<512x2xf32>
    %cst_4 = arith.constant dense<0.000000e+00> : vector<1x2xf32>
    %5 = tpu.matmul %3, %4, %cst_4 {dimension_numbers = #tpu.dot_dimension_numbers<[1], [0], [0], [1], [0, 0, 1, 1], [], []>} : vector<1x512xf32>, vector<512x2xf32>, vector<1x2xf32> -> vector<1x2xf32>
    %cst_5 = arith.constant 3.906250e-03 : f32
    %6 = vector.broadcast %cst_5 : f32 to vector<1x2xf32>
    %7 = arith.mulf %5, %6 : vector<1x2xf32>
    %c0_6 = arith.constant 0 : index
    %c0_7 = arith.constant 0 : index
    %8 = vector.load %arg3[%c0_6, %c0_7] : memref<1x2xf32, #tpu.memory_space<vmem>>, vector<1x2xf32>
    %9 = arith.addf %7, %8 : vector<1x2xf32>
    %cst_8 = arith.constant 0.000000e+00 : f32
    %10 = vector.broadcast %cst_8 : f32 to vector<1x2xf32>
    %11 = arith.maximumf %9, %10 : vector<1x2xf32>
    %c0_9 = arith.constant 0 : index
    %c0_10 = arith.constant 0 : index
    %12 = vector.load %arg4[%c0_9, %c0_10] : memref<2x512xf32, #tpu.memory_space<vmem>>, vector<2x512xf32>
    %cst_11 = arith.constant dense<0.000000e+00> : vector<1x512xf32>
    %13 = tpu.matmul %11, %12, %cst_11 {dimension_numbers = #tpu.dot_dimension_numbers<[1], [0], [0], [1], [0, 0, 1, 1], [], []>} : vector<1x2xf32>, vector<2x512xf32>, vector<1x512xf32> -> vector<1x512xf32>
    %c0_12 = arith.constant 0 : index
    %c0_13 = arith.constant 0 : index
    %14 = vector.load %arg5[%c0_12, %c0_13] : memref<1x512xf32, #tpu.memory_space<vmem>>, vector<1x512xf32>
    %15 = arith.addf %13, %14 : vector<1x512xf32>
    %cst_14 = arith.constant 0.000000e+00 : f32
    %16 = vector.broadcast %cst_14 : f32 to vector<1x512xf32>
    %17 = arith.subf %16, %15 : vector<1x512xf32>
    %18 = math.exp %17 : vector<1x512xf32>
    %cst_15 = arith.constant 1.000000e+00 : f32
    %19 = vector.broadcast %cst_15 : f32 to vector<1x512xf32>
    %20 = arith.addf %19, %18 : vector<1x512xf32>
    %cst_16 = arith.constant 1.000000e+00 : f32
    %21 = vector.broadcast %cst_16 : f32 to vector<1x512xf32>
    %22 = arith.divf %21, %20 : vector<1x512xf32>
    %23 = vector.broadcast %22 : vector<1x512xf32> to vector<16x512xf32>
    %24 = arith.mulf %1, %23 : vector<16x512xf32>
    %25 = vector.shape_cast %24 : vector<16x512xf32> to vector<1x16x512xf32>
    %c0_17 = arith.constant 0 : index
    %c0_18 = arith.constant 0 : index
    %c0_19 = arith.constant 0 : index
    %26 = vector.load %arg6[%c0_17, %c0_18, %c0_19] : memref<1x16x512xf32, #tpu.memory_space<vmem>>, vector<1x16x512xf32>
    tpu.vector_store %arg6[%c0_17, %c0_18, %c0_19], %25 {strides = array<i32>} : memref<1x16x512xf32, #tpu.memory_space<vmem>>, vector<1x16x512xf32>,
    return
  }
  func.func @transform_0(%arg0: i32) -> (i32, i32, i32) {
    %c0_i32 = arith.constant 0 : i32
    %c0_i32_0 = arith.constant 0 : i32
    %c0_i32_1 = arith.constant 0 : i32
    return %arg0, %c0_i32, %c0_i32_0 : i32, i32, i32
  }
  func.func @transform_1(%arg0: i32) -> (i32, i32) {
    %c0_i32 = arith.constant 0 : i32
    %c0_i32_0 = arith.constant 0 : i32
    %c0_i32_1 = arith.constant 0 : i32
    return %c0_i32, %c0_i32_0 : i32, i32
  }
  func.func @transform_2(%arg0: i32) -> (i32, i32) {
    %c0_i32 = arith.constant 0 : i32
    %c0_i32_0 = arith.constant 0 : i32
    %c0_i32_1 = arith.constant 0 : i32
    return %c0_i32, %c0_i32_0 : i32, i32
  }
  func.func @transform_3(%arg0: i32) -> (i32, i32) {
    %c0_i32 = arith.constant 0 : i32
    %c0_i32_0 = arith.constant 0 : i32
    %c0_i32_1 = arith.constant 0 : i32
    return %c0_i32, %c0_i32_0 : i32, i32
  }
  func.func @transform_4(%arg0: i32) -> (i32, i32) {
    %c0_i32 = arith.constant 0 : i32
    %c0_i32_0 = arith.constant 0 : i32
    %c0_i32_1 = arith.constant 0 : i32
    return %c0_i32, %c0_i32_0 : i32, i32
  }
  func.func @transform_5(%arg0: i32) -> (i32, i32, i32) {
    %c0_i32 = arith.constant 0 : i32
    %c0_i32_0 = arith.constant 0 : i32
    %c0_i32_1 = arith.constant 0 : i32
    return %arg0, %c0_i32, %c0_i32_0 : i32, i32, i32
  }
}

</mosaic_0001>

<bundles_post_ra>
// kernel: tpu_custom_call.1
= control target key start
LH: loop header
LB: loop body
LE: loop exit
PB: predicated region body
PF: predicated region fallthrough
CT: control target
= control target key end

     0   :  { %10 = vsyncpa [#allocation3], 0  ;;  %s1231_s0 = inlined_call_operand.vmem [shape: f32[2,16,512], index: 0, kind: input, shape index: {}]   ;;  %s1232_s1 = inlined_call_operand.vmem [shape: f32[512,2], index: 1, kind: input, shape index: {}]   ;;  %s1233_s2 = inlined_call_operand.vmem [shape: f32[1,2], index: 2, kind: input, shape index: {}]   ;;  %s1234_s3 = inlined_call_operand.vmem [shape: f32[2,512], index: 3, kind: input, shape index: {}]   ;;  %s1235_s4 = inlined_call_operand.vmem [shape: f32[1,512], index: 4, kind: input, shape index: {}]   ;;  %s1236_s5 = inlined_call_operand.hbm [shape: f32[2,16,512], index: 5, kind: output, shape index: {}]  }
   0x1   :  { %12 = vsyncpa [#allocation3 + $0x1], 0  ;;  %s866_s18 = smov 0   ;;  %s868_s19 = smov 0  }
   0x2   :  { %s870_s20 = smov 0   ;;  %s872_s21 = smov 0  }
   0x3 LB: > { %s887_s22 = sadd.s32 4294967295, %s832_s21   ;;  %s691_s23 = sadd.s32 4294967294, %s832_s21   ;;  %s832_s21 = sphi %s872_s21, %s1242_s21   ;;  %s828_s20 = sphi %s870_s20, %s1241_s20   ;;  %s824_s19 = sphi %s868_s19, %s1240_s19   ;;  %s820_s18 = sphi %s866_s18, %s1239_s18  }
   0x4   : > { %s891_s24 = sadd.s32 1, %s832_s21   ;;  %s135_s25 = sadd.s32 1, %s828_s20 }
   0x5   : > { %s132_s26 = ssub.s32 %s832_s21, %s891_s24  ;;  %p145_p0 = scmp.ne.s32.totalorder %s828_s20, %s824_s19 }
   0x6   : > { %p133_p1 = scmp.eq.s32.totalorder %s132_s26, 0  ;;  %p146_p2 = scmp.eq.s32.totalorder %s887_s22, 1 }
   0x7   : > { %p151_p3 = scmp.ne.s32.totalorder %s824_s19, %s820_s18  ;;  %p152_p4 = scmp.eq.s32.totalorder %s691_s23, 1 }
   0x8   : > { %s902_s27 = scalar_select %p133_p1, %s828_s20, %s135_s25  }
   0x9   : > { %p904_p5 = por %p146_p2, %p145_p0  ;;  %p908_p6 = por %p152_p4, %p151_p3 }
   0xa   : > { %p694_p7 = scmp.ge.s32.totalorder %s832_s21, 1  ;;  %p190_p8 = scmp.lt.s32.totalorder %s832_s21, 3 }
   0xc   : > { %p191_p9 = pnand %p694_p7, %p190_p8 }
   0xd   : > { %p218_p10 = scmp.lt.s32.totalorder (!%p191_p9), %s887_s22, 1  ;;  %s215_s17 = sand.u32 (!%p191_p9), 1, %s824_s19  }
   0xe   : > { %194 = sbr.rel (%p191_p9) target bundleno = 370 (0x172), region = 40  ;;  %s695_s23 = sshll.u32 (!%p191_p9), %s215_s17, 6 }
   0xf   : > { %s712_s25 = sshll.u32 (!%p191_p9), %s887_s22, 6  ;;  %s1180_s26 = scalar_lea.vmem (!%p191_p9), [#allocation2], %s695_s23 }
  0x10   : > { %s625_s9 = scalar_lea.hbm (!%p191_p9), %s1236_s5, %s712_s25  ;;  %s614_s11 = scalar_lea.sflag (!%p191_p9), [#allocation3], %s215_s17 }
  0x11   : > { %s628_s10 = sshll.u32 (!%p191_p9), %s625_s9, 4  ;;  %s790_s15 = scalar_lea.hbm (!%p191_p9), %s1236_s5, 128  ;;  %s629_s10 = int_to_ptr.hbm [resolvable:$true] %s628_s10 }
  0x12   : > { %s784_s12 = sshra.s32 (!%p191_p9), %s629_s10, 4  ;;  %s785_s12 = int_to_ptr.hbm [resolvable:$true] %s784_s12 }
  0x13   : > { %v306_v0 = vld [vmem:[%s1232_s1 + $0x178] sm:$0xff]  ;;  %v305_v1 = vld [vmem:[%s1232_s1 + $0x170] sm:$0xff]  ;;  %v304_v5 = vld [vmem:[%s1232_s1 + $0x168] sm:$0xff]  ;;  %s990_s30 = scalar_select %p218_p10, %s887_s22, 1  ;;  %vm428_vm0 = vcmask 1041408   ;;  %vm424_vm1 = vcmask 15360  }
  0x14   : > { %v322_v2 = vld [vmem:[%s1232_s1 + $0x1f8] sm:$0xff]  ;;  %363 = vmatpush.msra.mxu2 %v306_v0  ;;  %v321_v6 = vld [vmem:[%s1232_s1 + $0x1f0] sm:$0xff]  ;;  %v320_v9 = vld [vmem:[%s1232_s1 + $0x1e8] sm:$0xff]  ;;  %s786_s13 = scalar_lea.hbm %s785_s12, 64  ;;  %p791_p0 = scmp.lt.s32.totalorder %s785_s12, %s1236_s5 }
  0x15   : > { %383 = vmatpush.msra.mxu3 %v322_v2  ;;  %v274_v3 = vld [vmem:[%s1232_s1 + $0x78] sm:$0xff]  ;;  %v273_v7 = vld [vmem:[%s1232_s1 + $0x70] sm:$0xff]  ;;  %v272_v10 = vld [vmem:[%s1232_s1 + $0x68] sm:$0xff]  ;;  %s711_s7 = sshll.u32 %s990_s30, 6  ;;  %p787_p11 = scmp.ne.s32.totalorder %s785_s12, %s786_s13 }
  0x16   : > { %v290_v4 = vld [vmem:[%s1232_s1 + $0xf8] sm:$0xff]  ;;  %323 = vmatpush.msra.mxu0 %v274_v3  ;;  %v289_v8 = vld [vmem:[%s1232_s1 + $0xf0] sm:$0xff]  ;;  %364 = vmatpush.msra.mxu2 %v305_v1  ;;  %v303_v11 = vld [vmem:[%s1232_s1 + $0x160] sm:$0xff]  ;;  %s1038_s6 = scalar_lea.vmem %s1231_s0, %s711_s7  ;;  %p792_p1 = scmp.lt.s32.totalorder %s790_s15, %s786_s13 }
  0x17   : > { %343 = vmatpush.msra.mxu1 %v290_v4  ;;  %384 = vmatpush.msra.mxu3 %v321_v6  ;;  %v288_v12 = vld [vmem:[%s1232_s1 + $0xe8] sm:$0xff]  ;;  %v319_v13 = vld [vmem:[%s1232_s1 + $0x1e0] sm:$0xff]  ;;  %v302_v16 = vld [vmem:[%s1232_s1 + $0x158] sm:$0xff]  ;;  %p788_p12 = pnand %p787_p11, %p904_p5 }
  0x18   : > { %324 = vmatpush.msra.mxu0 %v273_v7  ;;  %365 = vmatpush.msra.mxu2 %v304_v5  ;;  %v271_v14 = vld [vmem:[%s1232_s1 + $0x60] sm:$0xff]  ;;  %v318_v17 = vld [vmem:[%s1232_s1 + $0x1d8] sm:$0xff]  ;;  %v301_v20 = vld [vmem:[%s1232_s1 + $0x150] sm:$0xff]  ;;  %p793_p2 = por %p792_p1, %p791_p0 }
  0x19   : > { %344 = vmatpush.msra.mxu1 %v289_v8  ;;  %385 = vmatpush.msra.mxu3 %v320_v9  ;;  %v287_v15 = vld [vmem:[%s1232_s1 + $0xe0] sm:$0xff]  ;;  %v270_v18 = vld [vmem:[%s1232_s1 + $0x58] sm:$0xff]  ;;  %v317_v21 = vld [vmem:[%s1232_s1 + $0x1d0] sm:$0xff]  ;;  %p789_p13 = pneg %p788_p12 }
  0x1a   : > { %325 = vmatpush.msra.mxu0 %v272_v10  ;;  %366 = vmatpush.msra.mxu2 %v303_v11  ;;  %v286_v19 = vld [vmem:[%s1232_s1 + $0xd8] sm:$0xff]  ;;  %v269_v22 = vld [vmem:[%s1232_s1 + $0x50] sm:$0xff]  ;;  %v300_v24 = vld [vmem:[%s1232_s1 + $0x148] sm:$0xff] }
  0x1b   : > { %345 = vmatpush.msra.mxu1 %v288_v12  ;;  %386 = vmatpush.msra.mxu3 %v319_v13  ;;  %v285_v23 = vld [vmem:[%s1232_s1 + $0xd0] sm:$0xff]  ;;  %v316_v25 = vld [vmem:[%s1232_s1 + $0x1c8] sm:$0xff]  ;;  %v299_v28 = vld [vmem:[%s1232_s1 + $0x140] sm:$0xff]  ;;  %p794_p3 = pnand %p793_p2, %p789_p13 }
  0x1c   : > { %326 = vmatpush.msra.mxu0 %v271_v14  ;;  %367 = vmatpush.msra.mxu2 %v302_v16  ;;  %v268_v26 = vld [vmem:[%s1232_s1 + $0x48] sm:$0xff]  ;;  %v315_v29 = vld [vmem:[%s1232_s1 + $0x1c0] sm:$0xff]  ;;  %v298_v32 = vld [vmem:[%s1232_s1 + $0x138] sm:$0xff] }
  0x1d   : > { %346 = vmatpush.msra.mxu1 %v287_v15  ;;  %387 = vmatpush.msra.mxu3 %v318_v17  ;;  %v284_v27 = vld [vmem:[%s1232_s1 + $0xc8] sm:$0xff]  ;;  %v267_v30 = vld [vmem:[%s1232_s1 + $0x40] sm:$0xff]  ;;  %v314_v33 = vld [vmem:[%s1232_s1 + $0x1b8] sm:$0xff] }
  0x1e   : > { %327 = vmatpush.msra.mxu0 %v270_v18  ;;  %368 = vmatpush.msra.mxu2 %v301_v20  ;;  %v283_v31 = vld [vmem:[%s1232_s1 + $0xc0] sm:$0xff]  ;;  %v266_v34 = vld [vmem:[%s1232_s1 + $0x38] sm:$0xff]  ;;  %v297_v36 = vld [vmem:[%s1232_s1 + $0x130] sm:$0xff] }
  0x1f   : > { %347 = vmatpush.msra.mxu1 %v286_v19  ;;  %388 = vmatpush.msra.mxu3 %v317_v21  ;;  %v282_v35 = vld [vmem:[%s1232_s1 + $0xb8] sm:$0xff]  ;;  %v313_v37 = vld [vmem:[%s1232_s1 + $0x1b0] sm:$0xff]  ;;  %v296_v38 = vld [vmem:[%s1232_s1 + $0x128] sm:$0xff] }
  0x20   : > { %328 = vmatpush.msra.mxu0 %v269_v22  ;;  %369 = vmatpush.msra.mxu2 %v300_v24  ;;  %v265_v39 = vld [vmem:[%s1232_s1 + $0x30] sm:$0xff]  ;;  %v295_v41 = vld [vmem:[%s1232_s1 + $0x120] sm:$0xff]  ;;  %v312_v42 = vld [vmem:[%s1232_s1 + $0x1a8] sm:$0xff] }
  0x21   : > { %348 = vmatpush.msra.mxu1 %v285_v23  ;;  %389 = vmatpush.msra.mxu3 %v316_v25  ;;  %v281_v40 = vld [vmem:[%s1232_s1 + $0xb0] sm:$0xff]  ;;  %v264_v43 = vld [vmem:[%s1232_s1 + $0x28] sm:$0xff]  ;;  %v311_v45 = vld [vmem:[%s1232_s1 + $0x1a0] sm:$0xff] }
  0x22   : > { %329 = vmatpush.msra.mxu0 %v268_v26  ;;  %370 = vmatpush.msra.mxu2 %v299_v28  ;;  %v280_v44 = vld [vmem:[%s1232_s1 + $0xa8] sm:$0xff]  ;;  %v1065_v46 = vld [vmem:[%s1038_s6 + $0x10] sm:$0xff]  ;;  %v294_v47 = vld [vmem:[%s1232_s1 + $0x118] sm:$0xff] }
  0x23   : > { %349 = vmatpush.msra.mxu1 %v284_v27  ;;  %390 = vmatpush.msra.mxu3 %v315_v29  ;;  %v263_v48 = vld [vmem:[%s1232_s1 + $0x20] sm:$0xff]  ;;  %v1077_v50 = vld [vmem:[%s1038_s6 + $0x30] sm:$0xff]  ;;  %v310_v51 = vld [vmem:[%s1232_s1 + $0x198] sm:$0xff] }
  0x24   : > { %330 = vmatpush.msra.mxu0 %v267_v30  ;;  %371 = vmatpush.msra.mxu2 %v298_v32  ;;  %v279_v49 = vld [vmem:[%s1232_s1 + $0xa0] sm:$0xff]  ;;  %v245_v52 = vadd.f32 %v1077_v50, %v1065_v46  ;;  %v1085_v53 = vld [vmem:[%s1038_s6 + $0x18] sm:$0xff]  ;;  %v1105_v61 = vld [vmem:[%s1038_s6 + $0x8] sm:$0xff] }
  0x25   : > { %350 = vmatpush.msra.mxu1 %v283_v31  ;;  %391 = vmatpush.msra.mxu3 %v314_v33  ;;  %v1088_v54 = vld [vmem:[%s1038_s6 + $0x38] sm:$0xff]  ;;  %v1099_v58 = vld [vmem:[%s1038_s6] sm:$0xff]  ;;  %v1108_v62 = vld [vmem:[%s1038_s6 + $0x28] sm:$0xff] }
  0x26   : > { %331 = vmatpush.msra.mxu0 %v266_v34  ;;  %372 = vmatpush.msra.mxu2 %v297_v36  ;;  %v262_v55 = vld [vmem:[%s1232_s1 + $0x18] sm:$0xff]  ;;  %v252_v57 = vadd.f32 %v1088_v54, %v1085_v53  ;;  %v246_v59 = vrot.slane %v245_v52, 4  ;;  %v1102_v60 = vld [vmem:[%s1038_s6 + $0x20] sm:$0xff]  ;;  %v293_v63 = vld [vmem:[%s1232_s1 + $0x110] sm:$0xff]  ;;  %v238_v3 = vadd.f32 %v1108_v62, %v1105_v61  ;;  %s626_s6 = sshll.u32 %s1180_s26, 4  ;;  %s627_s6 = int_to_ptr.vmem [resolvable:$true] %s626_s6 }
  0x27   : > { %351 = vmatpush.msra.mxu1 %v282_v35  ;;  %392 = vmatpush.msra.mxu3 %v313_v37  ;;  %v278_v56 = vld [vmem:[%s1232_s1 + $0x98] sm:$0xff]  ;;  %v309_v0 = vld [vmem:[%s1232_s1 + $0x190] sm:$0xff]  ;;  %v231_v2 = vadd.f32 %v1102_v60, %v1099_v58  ;;  %v292_v7 = vld [vmem:[%s1232_s1 + $0x108] sm:$0xff] }
  0x28   : > { %332 = vmatpush.msra.mxu0 %v265_v39  ;;  %373 = vmatpush.msra.mxu2 %v296_v38  ;;  %v253_v1 = vrot.slane %v252_v57, 4  ;;  %v261_v4 = vld [vmem:[%s1232_s1 + $0x10] sm:$0xff]  ;;  %v247_v6 = vadd.f32 %v246_v59, %v245_v52  ;;  %v308_v8 = vld [vmem:[%s1232_s1 + $0x188] sm:$0xff]  ;;  %v239_v11 = vrot.slane %v238_v3, 4  ;;  %v291_v15 = vld [vmem:[%s1232_s1 + $0x100] sm:$0xff] }
  0x29   : > { %352 = vmatpush.msra.mxu1 %v281_v40  ;;  %393 = vmatpush.msra.mxu3 %v312_v42  ;;  %v277_v5 = vld [vmem:[%s1232_s1 + $0x90] sm:$0xff]  ;;  %v232_v10 = vrot.slane %v231_v2, 4  ;;  %v260_v13 = vld [vmem:[%s1232_s1 + $0x8] sm:$0xff]  ;;  %v307_v16 = vld [vmem:[%s1232_s1 + $0x180] sm:$0xff] }
  0x2a   : > { %333 = vmatpush.msra.mxu0 %v264_v43  ;;  %374 = vmatpush.msra.mxu2 %v295_v41  ;;  %v254_v9 = vadd.f32 %v253_v1, %v252_v57  ;;  %v248_v12 = vrot.slane %v247_v6, 2  ;;  %v276_v14 = vld [vmem:[%s1232_s1 + $0x88] sm:$0xff]  ;;  %v240_v19 = vadd.f32 %v239_v11, %v238_v3  ;;  %v259_v21 = vld [vmem:[%s1232_s1] sm:$0xff] }
  0x2b   : > { %353 = vmatpush.msra.mxu1 %v280_v44  ;;  %394 = vmatpush.msra.mxu3 %v311_v45  ;;  %v233_v18 = vadd.f32 %v232_v10, %v231_v2  ;;  %v275_v22 = vld [vmem:[%s1232_s1 + $0x80] sm:$0xff] }
  0x2c   : > { %334 = vmatpush.msra.mxu0 %v263_v48  ;;  %375 = vmatpush.msra.mxu2 %v294_v47  ;;  %v255_v17 = vrot.slane %v254_v9, 2  ;;  %v249_v20 = vadd.f32 %v248_v12, %v247_v6  ;;  %v241_v25 = vrot.slane %v240_v19, 2  ;;  %v407_v36 = vld [vmem:[%s1234_s3] sm:$0xff] }
  0x2d   : > { %354 = vmatpush.msra.mxu1 %v279_v49  ;;  %395 = vmatpush.msra.mxu3 %v310_v51  ;;  %v234_v24 = vrot.slane %v233_v18, 2  ;;  %410 = vst [vmem:[#allocation1] ss:$4 sm:$0xff] %v407_v36  ;;  %v404_v49 = vld [vmem:[%s1233_s2] sm:$0x1] }
  0x2e   : > { %335 = vmatpush.msra.mxu0 %v262_v55  ;;  %376 = vmatpush.msra.mxu2 %v293_v63  ;;  %v256_v23 = vadd.f32 %v255_v17, %v254_v9  ;;  %v250_v26 = vrot.slane %v249_v20, 1  ;;  %v242_v29 = vadd.f32 %v241_v25, %v240_v19 }
  0x2f   : > { %355 = vmatpush.msra.mxu1 %v278_v56  ;;  %396 = vmatpush.msra.mxu3 %v309_v0  ;;  %v235_v28 = vadd.f32 %v234_v24, %v233_v18  ;;  %v408_v56 = vld [vmem:[%s1235_s4] sm:$0xf] }
  0x30   : > { %336 = vmatpush.msra.mxu0 %v261_v4  ;;  %377 = vmatpush.msra.mxu2 %v292_v7  ;;  %v257_v27 = vrot.slane %v256_v23, 1  ;;  %v251_v30 = vadd.f32 %v250_v26, %v249_v20  ;;  %v243_v33 = vrot.slane %v242_v29, 1  ;;  %v416_v57 = vperm.slane %v408_v56, 0 }
  0x31   : > { %356 = vmatpush.msra.mxu1 %v277_v5  ;;  %397 = vmatpush.msra.mxu3 %v308_v8  ;;  %v236_v32 = vrot.slane %v235_v28, 1  ;;  %v417_v59 = vperm.slane %v408_v56, 1  ;;  %v418_v5 = vperm.slane %v408_v56, 2  ;;  %v419_v6 = vperm.slane %v408_v56, 3 }
  0x32   : > { %337 = vmatpush.msra.mxu0 %v260_v13  ;;  %378 = vmatpush.msra.mxu2 %v291_v15  ;;  %v258_v31 = vadd.f32 %v257_v27, %v256_v23  ;;  %v244_v35 = vadd.f32 %v243_v33, %v242_v29 }
  0x33   : > { %357 = vmatpush.msra.mxu1 %v276_v14  ;;  %398 = vmatpush.msra.mxu3 %v307_v16  ;;  %v237_v34 = vadd.f32 %v236_v32, %v235_v28 }
  0x34   : > { %338 = vmatpush.msra.mxu0 %v259_v21  ;;  %379 = vmatmul.f32.vlgmr.msra.gmra.mxu2 %v251_v30  ;;  %v413_v37 = vld.sshfl [vmem:[#allocation1 + $0x10] sm:$0xff pattern:$0x73625140]  ;;  %v414_v38 = vld.sshfl [vmem:[#allocation1 + $0x18] sm:$0xff pattern:$0x73625140] }
  0x35   : > { %358 = vmatpush.msra.mxu1 %v275_v22  ;;  %399 = vmatmul.f32.vlgmr.msra.gmra.mxu3 %v258_v31  ;;  %v411_v39 = vld.sshfl [vmem:[#allocation1] sm:$0xff pattern:$0x73625140]  ;;  %v412_v40 = vld.sshfl [vmem:[#allocation1 + $0x8] sm:$0xff pattern:$0x73625140] }
  0x36   : > { %339 = vmatmul.f32.vlgmr.msra.gmra.mxu0 %v237_v34  ;;  %359 = vmatmul.f32.vlgmr.msra.gmra.mxu1 %v244_v35 }
  0x37   : > { %702 = vmatpush.msk.msrb.mxu2 %vm428_vm0, %v413_v37  ;;  %704 = vmatpush.msk.msrb.mxu3 %vm428_vm0, %v414_v38 }
  0x38   : > { %698 = vmatpush.msk.msrb.mxu0 %vm428_vm0, %v411_v39  ;;  %700 = vmatpush.msk.msrb.mxu1 %vm428_vm0, %v412_v40 }
  0xb3   : > { %v340_v41 = vpop.f32.mrf.mxu0  ;;  %v360_v42 = vpop.f32.mrf.mxu1 }
  0xb4   : > { %v361_v43 = vadd.f32 %v360_v42, %v340_v41 }
  0xb7   : > { %v380_v44 = vpop.f32.mrf.mxu2 }
  0xb8   : > { %v381_v45 = vadd.f32 %v380_v44, %v361_v43  ;;  %v400_v47 = vpop.f32.mrf.mxu3 }
  0xba   : > { %v401_v48 = vadd.f32 %v400_v47, %v381_v45 }
  0xbc   : > { %v403_v51 = vmul.f32 0.00390625, %v401_v48 }
  0xbe   : > { %v405_v52 = vadd.f32 %v404_v49, %v403_v51 }
  0xc0   : > { %v406_v55 = vmax.f32 %v405_v52, 0.0 }
  0xc2   : > { %699 = vmatmul.msk.f32.vlgmr.msrb.gmra.mxu0 %vm424_vm1, %v406_v55  ;;  %701 = vmatmul.msk.f32.vlgmr.msrb.gmra.mxu1 %vm424_vm1, %v406_v55 }
  0xc3   : > { %703 = vmatmul.msk.f32.vlgmr.msrb.gmra.mxu2 %vm424_vm1, %v406_v55  ;;  %705 = vmatmul.msk.f32.vlgmr.msrb.gmra.mxu3 %vm424_vm1, %v406_v55 }
 0x13f   : > { %v454_v63 = vpop.f32.mrf.mxu0  ;;  %v474_v0 = vpop.f32.mrf.mxu1 }
 0x140   : > { %v455_v1 = vadd.f32 %v454_v63, %v416_v57  ;;  %v475_v2 = vadd.f32 %v474_v0, %v417_v59 }
 0x142   : > { %v517_v3 = vsub.f32 0.0, %v455_v1  ;;  %v518_v4 = vsub.f32 0.0, %v475_v2 }
 0x144   : > { %v521_v7 = vmul.f32 1.442695, %v517_v3  ;;  %v523_v8 = vmul.f32 1.442695, %v518_v4 }
 0x146   : > { %754 = vpow2.f32 %v521_v7  ;;  %v494_v9 = vpop.f32.mrf.mxu2  ;;  %v514_v10 = vpop.f32.mrf.mxu3 }
 0x147   : > { %756 = vpow2.f32 %v523_v8  ;;  %v495_v11 = vadd.f32 %v494_v9, %v418_v5  ;;  %v515_v12 = vadd.f32 %v514_v10, %v419_v6 }
 0x149   : > { %v519_v13 = vsub.f32 0.0, %v495_v11  ;;  %v520_v14 = vsub.f32 0.0, %v515_v12 }
 0x14b   : > { %v525_v15 = vmul.f32 1.442695, %v519_v13  ;;  %v527_v16 = vmul.f32 1.442695, %v520_v14 }
 0x14c   : > { %v755_v17 = vpop.eup %754 }
 0x14d   : > { %v757_v18 = vpop.eup %756  ;;  %v529_v19 = vadd.f32 1.0, %v755_v17  ;;  %758 = vpow2.f32 %v525_v15 }
 0x14e   : > { %v530_v20 = vadd.f32 1.0, %v757_v18  ;;  %760 = vpow2.f32 %v527_v16 }
 0x14f   : > { %762 = vrcp.f32 %v529_v19  ;;  %v542_v30 = vand.u32 2147483647, %v529_v19  ;;  %v544_v31 = vand.u32 2147483648, %v529_v19  ;;  %vm538_vm4 = vweird.f32 %v529_v19 }
 0x150   : > { %764 = vrcp.f32 %v530_v20  ;;  %v557_v33 = vand.u32 2147483647, %v530_v20  ;;  %v559_v35 = vand.u32 2147483648, %v530_v20  ;;  %vm553_vm6 = vweird.f32 %v530_v20 }
 0x151   : > { %vm543_vm5 = vcmp.eq.f32.partialorder %v542_v30, 8.507059e+37  ;;  %v545_v39 = vor.u32 1.1754944e-38, %v544_v31 }
 0x152   : > { %vm558_vm8 = vcmp.eq.f32.partialorder %v557_v33, 8.507059e+37  ;;  %v560_v44 = vor.u32 1.1754944e-38, %v559_v35 }
 0x153   : > { %v759_v21 = vpop.eup %758 }
 0x154   : > { %v761_v22 = vpop.eup %760  ;;  %v1159_v23 = vadd.f32 1.0, %v759_v21 }
 0x155   : > { %v763_v24 = vpop.eup %762  ;;  %v1161_v25 = vadd.f32 1.0, %v761_v22 }
 0x156   : > { %v765_v26 = vpop.eup %764  ;;  %v534_v27 = vmul.f32 %v763_v24, %v529_v19  ;;  %766 = vrcp.f32 %v1159_v23  ;;  %vm539_vm2 = vweird.f32 %v763_v24  ;;  %vm568_vm10 = vweird.f32 %v1159_v23 }
 0x157   : > { %v549_v28 = vmul.f32 %v765_v26, %v530_v20  ;;  %768 = vrcp.f32 %v1161_v25  ;;  %vm554_vm3 = vweird.f32 %v765_v26  ;;  %vm540_vm7 = vmor %vm538_vm4, %vm539_vm2  ;;  %v572_v45 = vand.u32 2147483647, %v1159_v23 }
 0x158   : > { %v535_v29 = vsub.f32 1.0, %v534_v27  ;;  %vm555_vm9 = vmor %vm553_vm6, %vm554_vm3  ;;  %v574_v56 = vand.u32 2147483648, %v1159_v23  ;;  %v587_v57 = vand.u32 2147483647, %v1161_v25  ;;  %v589_v3 = vand.u32 2147483648, %v1161_v25 }
 0x159   : > { %v550_v32 = vsub.f32 1.0, %v549_v28  ;;  %vm573_vm14 = vcmp.eq.f32.partialorder %v572_v45, 8.507059e+37  ;;  %vm583_vm15 = vweird.f32 %v1161_v25 }
 0x15a   : > { %v536_v34 = vmul.f32 %v763_v24, %v535_v29  ;;  %v590_v8 = vor.u32 1.1754944e-38, %v589_v3  ;;  %vm588_vm1 = vcmp.eq.f32.partialorder %v587_v57, 8.507059e+37 }
 0x15b   : > { %v551_v36 = vmul.f32 %v765_v26, %v550_v32 }
 0x15c   : > { %v767_v37 = vpop.eup %766  ;;  %v537_v38 = vadd.f32 %v763_v24, %v536_v34 }
 0x15d   : > { %v552_v40 = vadd.f32 %v765_v26, %v551_v36  ;;  %v564_v41 = vmul.f32 %v767_v37, %v1159_v23  ;;  %v769_v42 = vpop.eup %768  ;;  %vm569_vm11 = vweird.f32 %v767_v37 }
 0x15e   : > { %v541_v43 = vsel %vm540_vm7, %v763_v24, %v537_v38  ;;  %v579_v51 = vmul.f32 %v769_v42, %v1161_v25  ;;  %vm584_vm12 = vweird.f32 %v769_v42  ;;  %vm570_vm13 = vmor %vm568_vm10, %vm569_vm11 }
 0x15f   : > { %v546_v47 = vsel %vm543_vm5, %v545_v39, %v541_v43  ;;  %v556_v48 = vsel %vm555_vm9, %v765_v26, %v552_v40  ;;  %v565_v49 = vsub.f32 1.0, %v564_v41  ;;  %vm585_vm0 = vmor %vm583_vm15, %vm584_vm12 }
 0x160   : > { %v593_v52 = vperm.slane %v546_v47, 0  ;;  %v561_v55 = vsel %vm558_vm8, %v560_v44, %v556_v48  ;;  %v580_v0 = vsub.f32 1.0, %v579_v51 }
 0x161   : > { %v594_v59 = vperm.slane %v561_v55, 0  ;;  %v566_v63 = vmul.f32 %v767_v37, %v565_v49 }
 0x162   : > { %v597_v1 = vmul.f32 %v593_v52, %v1099_v58  ;;  %v601_v2 = vmul.f32 %v593_v52, %v1102_v60  ;;  %v581_v7 = vmul.f32 %v769_v42, %v580_v0  ;;  %v575_v58 = vor.u32 1.1754944e-38, %v574_v56 }
 0x163   : > { %v598_v4 = vmul.f32 %v594_v59, %v1105_v61  ;;  %v602_v5 = vmul.f32 %v594_v59, %v1108_v62  ;;  %v567_v6 = vadd.f32 %v767_v37, %v566_v63 }
 0x164   : > { %605 = vst [vmem:[%s1180_s26] sm:$0xff] %v597_v1  ;;  %v582_v61 = vadd.f32 %v769_v42, %v581_v7 }
 0x165   : > { %609 = vst [vmem:[%s1180_s26 + $0x20] sm:$0xff] %v601_v2  ;;  %v571_v60 = vsel %vm570_vm13, %v767_v37, %v567_v6 }
 0x166   : > { %606 = vst [vmem:[%s1180_s26 + $0x8] sm:$0xff] %v598_v4  ;;  %v576_v62 = vsel %vm573_vm14, %v575_v58, %v571_v60  ;;  %v586_v10 = vsel %vm585_vm0, %v769_v42, %v582_v61 }
 0x167   : > { %610 = vst [vmem:[%s1180_s26 + $0x28] sm:$0xff] %v602_v5  ;;  %v595_v9 = vperm.slane %v576_v62, 0  ;;  %v591_v11 = vsel %vm588_vm1, %v590_v8, %v586_v10 }
 0x168   : > { %v596_v14 = vperm.slane %v591_v11, 0 }
 0x169   : > { %v599_v12 = vmul.f32 %v595_v9, %v1065_v46  ;;  %v603_v13 = vmul.f32 %v595_v9, %v1077_v50 }
 0x16a   : > { %v600_v15 = vmul.f32 %v596_v14, %v1085_v53  ;;  %v604_v16 = vmul.f32 %v596_v14, %v1088_v54 }
 0x16b   : > { %607 = vst [vmem:[%s1180_s26 + $0x10] sm:$0xff] %v599_v12 }
 0x16c   : > { %611 = vst [vmem:[%s1180_s26 + $0x30] sm:$0xff] %v603_v13 }
 0x16d   : > { %608 = vst [vmem:[%s1180_s26 + $0x18] sm:$0xff] %v600_v15 }
 0x16e   : > { %612 = vst [vmem:[%s1180_s26 + $0x38] sm:$0xff] %v604_v16 }
 0x16f   : > { %797 = shalt.err (!%p794_p3)
}
 0x170   : > { %s834_s17 = smov 512   ;;  %s835_s23 = smov 32  }
 0x171   : > { %713 = dma.vmem_to_hbm [thread:$0]  (%p904_p5), %s627_s6, 1024, %s629_s10, %s614_s11, %s834_s17, %s834_s17, %s835_s23  }
 0x172 PF: > { %p719_p4 = scmp.ge.s32.totalorder %s832_s21, 2  ;;  %s643_s25 = sand.u32 1, %s820_s18  }
 0x173   : > { %s644_s26 = scalar_lea.sflag [#allocation3], %s643_s25 }
 0x174   : > { %p716_p7 = pnand %p719_p4, %p908_p6 }
 0x176   : > { %p717_p8 = pneg %p716_p7 }
 0x178   : > { %815 = dma.done.wait (%p717_p8), %s644_s26, 1024  }
 0x179   : > { %817 = vsyncadd (%p717_p8), %s644_s26, 4294966272  ;;  %p15_p9 = scmp.ge.s32.totalorder %s891_s24, 4   ;;  %s1239_s18 = smov %s824_s19 }
 0x17a   : > { %s1240_s19 = smov %s828_s20  ;;  %s1241_s20 = smov %s902_s27 }
 0x17b   : > { %s1242_s21 = smov %s891_s24  ;;  %17 = sbr.rel (!%p15_p9) target bundleno = 3 (0x3), region = 75 }
 0x180   :  { %650 = vsyncpa [#allocation3], 1 }
 0x181   :  { %652 = vsyncpa [#allocation3 + $0x1], 1 }

</bundles_post_ra>
